<compile_context>
chip_gen: v6e
topology: v6e:2x2x1
jax: 0.10.0
libtpu: 0.0.40
codegen_flags: <defaults>
</compile_context>

<pallas_src>
import functools

import jax
import jax.numpy as jnp
from jax import lax
from jax.experimental import pallas as pl
from jax.experimental.pallas import tpu as pltpu


def _round_up(v, m):
    return (v + m - 1) // m * m


def _pad_cast_2d(a, rows, cols, dtype):
    """Zero-pad a 2-D array to (rows, cols) and cast. No-op when already aligned."""
    r, c = a.shape
    if (r, c) != (rows, cols):
        a = jnp.zeros((rows, cols), a.dtype).at[:r, :c].set(a)
    return a.astype(dtype)


def _pad_cast_3d(a, d1, d2, dtype):
    """Zero-pad the trailing two dims of a 3-D array to (d1, d2) and cast."""
    num, r, c = a.shape
    if (r, c) != (d1, d2):
        a = jnp.zeros((num, d1, d2), a.dtype).at[:, :r, :c].set(a)
    return a.astype(dtype)


# ----------------------------- Pallas kernel -------------------------------

def _stack_kernel(x_hbm_ref, adj_ref, w_ref, b_ref, o_ref, seed_sem, *,
                  num_layers, skipsum, l2norm, mm_dtype):
    """Whole GNN stack: one grid step per layer; node state resident in o_ref."""
    l = pl.program_id(0)

    # Seed the resident state with x (single HBM->VMEM DMA, layer 0 only).
    # Correctness relies on the layer axis being sequential ("arbitrary").
    @pl.when(l == 0)
    def _seed():
        cp = pltpu.make_async_copy(x_hbm_ref, o_ref, seed_sem)
        cp.start()
        cp.wait()

    x = o_ref[...]                                       # f32 [Np, Dp] carried state
    w = w_ref[...]                                       # [Dp, Dp] (Squeezed layer dim)

    # H = X @ W   (MXU, f32 accumulation)
    h = jnp.dot(x.astype(mm_dtype), w, preferred_element_type=jnp.float32)
    # M = A @ H   (MXU, f32 accumulation) -- A stays resident in VMEM across layers
    m = jnp.dot(adj_ref[...], h.astype(mm_dtype), preferred_element_type=jnp.float32)

    y = jnp.maximum(m + b_ref[...], 0.0)                 # bias + ReLU (VPU, f32)
    if skipsum:
        y = x + y                                        # batch.x = x + batch.x (f32)
    o_ref[...] = y                                       # revisited block: no HBM
                                                         # writeback until the end

    @pl.when(l == num_layers - 1)
    def _finalize():
        if l2norm:
            # F.normalize(x, p=2, dim=-1): rsqrt (EUP) + multiply; exact enough
            # for 1e-5 tolerance (not the approx reciprocal path).
            out = o_ref[...]
            sq = jnp.sum(out * out, axis=-1, keepdims=True)
            o_ref[...] = out * lax.rsqrt(jnp.maximum(sq, 1e-24))


# ------------------------------ JAX wrappers -------------------------------

def _gnn_stack_fused(x, adjp, weights, biases, *, skipsum, l2norm, mm_dtype):
    """x: [N, d_in] f32; adjp: [Np, Np] padded+cast adjacency;
    weights: [L, d_in, d_out]; biases: [L, 1, d_out]."""
    N, d_in = x.shape
    Np = adjp.shape[0]
    L, w_in, d_out = weights.shape
    assert w_in == d_in, f"weight d_in {w_in} != feature dim {d_in}"
    assert adjp.shape == (Np, Np)
    assert biases.shape == (L, 1, d_out)
    if skipsum:
        assert d_in == d_out, (
            "stage_type='skipsum' requires dim_in == dim_out "
            f"(got {d_in} vs {d_out})")

    # Feature dim padded to a 128-lane multiple (lane-dense output, full MXU
    # columns); node dim already padded (with adj) to an 8-sublane multiple.
    # Zero padding is exact through matmul + bias + ReLU + residual + L2 norm.
    Dp = _round_up(max(d_in, d_out), 128)
    xp = _pad_cast_2d(x, Np, Dp, jnp.float32)            # seed stays f32 (exact)
    wp = _pad_cast_3d(weights, Dp, Dp, mm_dtype)         # matmul inputs in mm_dtype
    bp = _pad_cast_3d(biases, 1, Dp, jnp.float32)        # bias added in f32

    mm_isz = jnp.dtype(mm_dtype).itemsize
    flops = int(L * (2 * Np * Dp * Dp + 2 * Np * Np * Dp))
    bytes_accessed = int(xp.size * 4 + adjp.size * mm_isz + wp.size * mm_isz
                         + bp.size * 4 + Np * Dp * 4)
    cost = pl.CostEstimate(flops=flops,
                           transcendentals=int(Np) if l2norm else 0,
                           bytes_accessed=bytes_accessed)

    # Resident VMEM footprint (adj + state single-buffered, W/b double-buffered);
    # raise the scoped limit accordingly (defaults: 16 MiB v5e / 32 MiB v6e, v7x).
    resident_bytes = (Np * Np * mm_isz          # adj, single-buffered
                      + Np * Dp * 4             # node state / output block
                      + 2 * Dp * Dp * mm_isz    # streamed W_l (double-buffered)
                      + 2 * 8 * 128 * 4)        # streamed b_l tiles
    vmem_limit = int(min(max(2 * resident_bytes, 32 << 20), 120 << 20))

    kern = functools.partial(_stack_kernel, num_layers=L, skipsum=skipsum,
                             l2norm=l2norm, mm_dtype=mm_dtype)

    def call(single_buffer_resident):
        if single_buffer_resident:
            mode = pl.Buffered(buffer_count=1)   # revisited blocks never re-DMA
            adj_spec = pl.BlockSpec((Np, Np), lambda l: (0, 0), pipeline_mode=mode)
            out_spec = pl.BlockSpec((Np, Dp), lambda l: (0, 0), pipeline_mode=mode)
        else:
            adj_spec = pl.BlockSpec((Np, Np), lambda l: (0, 0))
            out_spec = pl.BlockSpec((Np, Dp), lambda l: (0, 0))

        grid_spec = pltpu.PrefetchScalarGridSpec(
            num_scalar_prefetch=0,
            grid=(L,),                            # one grid step per layer
            in_specs=[
                pl.BlockSpec(memory_space=pl.ANY),                      # x in HBM (seed DMA)
                adj_spec,                                               # adj, resident
                pl.BlockSpec((pl.Squeezed(), Dp, Dp), lambda l: (l, 0, 0)),  # W_l -> 2-D
                pl.BlockSpec((pl.Squeezed(), 1, Dp), lambda l: (l, 0, 0)),   # b_l -> 2-D
            ],
            out_specs=out_spec,                   # carried node state / final output
            scratch_shapes=[pltpu.SemaphoreType.DMA],   # seed-copy semaphore
        )
        return pl.pallas_call(
            kern,
            out_shape=jax.ShapeDtypeStruct((Np, Dp), jnp.float32),
            grid_spec=grid_spec,
            compiler_params=pltpu.CompilerParams(
                dimension_semantics=("arbitrary",),   # layers are sequential
                vmem_limit_bytes=vmem_limit,
            ),
            cost_estimate=cost,
        )(xp, adjp, wp, bp)

    try:
        out = call(True)
    except Exception:
        # Fallback for jax builds where pipeline_mode=pl.Buffered(1) is not
        # accepted by the top-level pallas_call pipeline; semantics identical.
        out = call(False)
    return out[:N, :d_out]


def gnn_stack_stage(x, adj, params, *, stage_type="skipsum", l2norm=True,
                    compute_dtype=jnp.bfloat16):
    """Forward pass of GNNStackStage. `params` is a list of (W, b) per layer.

    compute_dtype: dtype of the MXU matmul inputs (adj, W); accumulation, bias,
    residual and L2 norm are always f32. Default bf16 (pass jnp.float32 for
    tight parity with the f32 PyTorch module)."""
    mm_dtype = jnp.dtype(compute_dtype)
    N = x.shape[0]
    assert adj.shape == (N, N), f"adjacency must be [N, N], got {adj.shape}"
    num_layers = len(params)

    # Pad/cast the adjacency ONCE (hoisted out of the skipconcat per-layer loop).
    Np = _round_up(N, 8)
    adjp = _pad_cast_2d(adj, Np, Np, mm_dtype)

    if stage_type in ("stack", "skipsum"):
        d = x.shape[1]
        for w, _ in params:
            if w.shape != (d, d):
                raise ValueError(
                    f"stage_type={stage_type!r} fused stack requires square "
                    f"dim_in == dim_out == {d} weights; got {w.shape}")
        weights = jnp.stack([w for w, _ in params], axis=0)   # [L, D, D]
        biases = jnp.stack([b for _, b in params], axis=0)    # [L, 1, D]
        return _gnn_stack_fused(x, adjp, weights, biases,
                                skipsum=(stage_type == "skipsum"),
                                l2norm=l2norm, mm_dtype=mm_dtype)
    elif stage_type == "skipconcat":
        # skipconcat changes d_in per layer, so weights can't be stacked; run one
        # fused call per layer (L=1). The concat is pure layout glue in JAX; the
        # final layer's output is NOT concatenated, so its L2 norm stays in-kernel.
        for i, (w, b) in enumerate(params):
            last = i == num_layers - 1
            y = _gnn_stack_fused(x, adjp, w[None], b[None], skipsum=False,
                                 l2norm=(l2norm and last), mm_dtype=mm_dtype)
            x = y if last else jnp.concatenate([x, y], axis=1)
        return x
    else:
        raise ValueError(f"unknown stage_type {stage_type!r}")


# ----------------------- deterministic parameter init ----------------------

def init_params(key, dim_in, dim_out, num_layers, stage_type="skipsum"):
    params = []
    for i in range(num_layers):
        if stage_type == "skipconcat":
            d_in = dim_in if i == 0 else dim_in + i * dim_out
        else:
            d_in = dim_in if i == 0 else dim_out
        key, kw, kb = jax.random.split(key, 3)
        scale = jnp.sqrt(6.0 / (d_in + dim_out)).astype(jnp.float32)
        w = jax.random.uniform(kw, (d_in, dim_out), jnp.float32, -scale, scale)
        b = 0.01 * jax.random.normal(kb, (1, dim_out), jnp.float32)
        params.append((w, b))
    return params


def make_normalized_adj(key, n):
    """Dense symmetrically normalized adjacency with self-loops."""
    a = (jax.random.uniform(key, (n, n)) < 0.15).astype(jnp.float32)
    a = jnp.maximum(a, a.T)
    a = jnp.maximum(a, jnp.eye(n, dtype=jnp.float32))          # self-loops
    deg = jnp.sum(a, axis=1)
    d_inv_sqrt = 1.0 / jnp.sqrt(deg)
    return a * d_inv_sqrt[:, None] * d_inv_sqrt[None, :]


# ------------------------------ pure-JAX ref --------------------------------

def ref_stage(x, adj, params, *, stage_type="skipsum", l2norm=True):
    num_layers = len(params)
    for i, (w, b) in enumerate(params):
        x_in = x
        y = jnp.maximum(adj @ (x @ w) + b, 0.0)
        if stage_type == "skipsum":
            x = x_in + y
        elif stage_type == "skipconcat" and i < num_layers - 1:
            x = jnp.concatenate([x_in, y], axis=1)
        else:
            x = y
    if l2norm:
        n = jnp.sqrt(jnp.sum(x * x, axis=-1, keepdims=True))
        x = x / jnp.maximum(n, 1e-12)
    return x


# ---------------------------------- main ------------------------------------

if __name__ == "__main__":
    N = 64          # number of graph nodes
    DIM = 32        # dim_in == dim_out (required for skipsum)
    NUM_LAYERS = 3

    key = jax.random.PRNGKey(0)
    kx, kadj, kparams = jax.random.split(key, 3)

    x = jax.random.normal(kx, (N, DIM), jnp.float32)
    adj = make_normalized_adj(kadj, N)
    params = init_params(kparams, DIM, DIM, NUM_LAYERS, "skipsum")

    ref = ref_stage(x, adj, params, stage_type="skipsum", l2norm=True)

    # --- skipsum_gn stage, full-f32 path: must match the reference tightly ---
    out_f32 = jax.block_until_ready(
        gnn_stack_stage(x, adj, params, stage_type="skipsum", l2norm=True,
                        compute_dtype=jnp.float32))
    assert out_f32.shape == (N, DIM)
    assert jnp.allclose(out_f32, ref, atol=1e-5, rtol=1e-5), "skipsum f32 mismatch"

    # --- default path (bf16 MXU inputs, f32 accumulation/residual/L2 norm) ---
    out_def = jax.block_until_ready(
        gnn_stack_stage(x, adj, params, stage_type="skipsum", l2norm=True))
    assert float(jnp.max(jnp.abs(out_def - ref))) < 1e-1, "bf16-default path diverged"

    # --- skipconcat glue path (per-layer fused calls, adj padded once) ---
    params_sc = init_params(kparams, DIM, DIM, 2, "skipconcat")
    out_sc = jax.block_until_ready(
        gnn_stack_stage(x, adj, params_sc, stage_type="skipconcat", l2norm=True,
                        compute_dtype=jnp.float32))
    ref_sc = ref_stage(x, adj, params_sc, stage_type="skipconcat", l2norm=True)
    assert jnp.allclose(out_sc, ref_sc, atol=1e-4, rtol=1e-4), "skipconcat mismatch"

    print("KERNEL_OK")
</pallas_src>

<mosaic_0001>
module attributes {stable_mosaic.version = 11 : i64} {
  func.func @_stack_kernel(%arg0: i32, %arg1: memref<64x128xf32, #tpu.memory_space<any>>, %arg2: memref<64x64xf32, #tpu.memory_space<vmem>>, %arg3: memref<1x128x128xf32, #tpu.memory_space<vmem>>, %arg4: memref<1x1x128xf32, #tpu.memory_space<vmem>>, %arg5: memref<64x128xf32, #tpu.memory_space<vmem>>, %arg6: memref<!tpu.dma_semaphore, #tpu.memory_space<semaphore_mem>>) attributes {dimension_semantics = [#tpu.dimension_semantics<arbitrary>], iteration_bounds = array<i64: 3>, scalar_prefetch = 0 : i64, scratch_operands = 1 : i64, tpu.core_type = #tpu.core_type<tc>, window_params = [{}, {pipeline_mode = #tpu.pipeline_mode<synchronous>, transform_indices = @transform_1, window_bounds = array<i64: 64, 64>}, {transform_indices = @transform_2, window_bounds = array<i64: 1, 128, 128>}, {transform_indices = @transform_3, window_bounds = array<i64: 1, 1, 128>}, {pipeline_mode = #tpu.pipeline_mode<synchronous>, transform_indices = @transform_4, window_bounds = array<i64: 64, 128>}]} {
    %c0_i32 = arith.constant 0 : i32
    %0 = arith.cmpi eq, %arg0, %c0_i32 : i32
    %1 = arith.extui %0 : i1 to i32
    %c0_i32_0 = arith.constant 0 : i32
    %2 = arith.cmpi ne, %1, %c0_i32_0 : i32
    scf.if %2 {
      tpu.enqueue_dma source(%arg1 : memref<64x128xf32, #tpu.memory_space<any>>) target(%arg5 : memref<64x128xf32, #tpu.memory_space<vmem>>) target_semaphore(%arg6 : memref<!tpu.dma_semaphore, #tpu.memory_space<semaphore_mem>>)
      tpu.wait_dma2 semaphore(%arg6 : memref<!tpu.dma_semaphore, #tpu.memory_space<semaphore_mem>>) src(%arg1 : memref<64x128xf32, #tpu.memory_space<any>>) dst(%arg5 : memref<64x128xf32, #tpu.memory_space<vmem>>)
    } else {
    }
    %c0 = arith.constant 0 : index
    %c0_1 = arith.constant 0 : index
    %3 = vector.load %arg5[%c0, %c0_1] : memref<64x128xf32, #tpu.memory_space<vmem>>, vector<64x128xf32>
    %c0_2 = arith.constant 0 : index
    %c0_3 = arith.constant 0 : index
    %c0_4 = arith.constant 0 : index
    %4 = vector.load %arg3[%c0_2, %c0_3, %c0_4] : memref<1x128x128xf32, #tpu.memory_space<vmem>>, vector<1x128x128xf32>
    %5 = vector.shape_cast %4 : vector<1x128x128xf32> to vector<128x128xf32>
    %cst = arith.constant dense<0.000000e+00> : vector<64x128xf32>
    %6 = tpu.matmul %3, %5, %cst {dimension_numbers = #tpu.dot_dimension_numbers<[1], [0], [0], [1], [0, 0, 1, 1], [], []>} : vector<64x128xf32>, vector<128x128xf32>, vector<64x128xf32> -> vector<64x128xf32>
    %c0_5 = arith.constant 0 : index
    %c0_6 = arith.constant 0 : index
    %7 = vector.load %arg2[%c0_5, %c0_6] : memref<64x64xf32, #tpu.memory_space<vmem>>, vector<64x64xf32>
    %cst_7 = arith.constant dense<0.000000e+00> : vector<64x128xf32>
    %8 = tpu.matmul %7, %6, %cst_7 {dimension_numbers = #tpu.dot_dimension_numbers<[1], [0], [0], [1], [0, 0, 1, 1], [], []>} : vector<64x64xf32>, vector<64x128xf32>, vector<64x128xf32> -> vector<64x128xf32>
    %c0_8 = arith.constant 0 : index
    %c0_9 = arith.constant 0 : index
    %c0_10 = arith.constant 0 : index
    %9 = vector.load %arg4[%c0_8, %c0_9, %c0_10] : memref<1x1x128xf32, #tpu.memory_space<vmem>>, vector<1x1x128xf32>
    %10 = vector.shape_cast %9 : vector<1x1x128xf32> to vector<1x128xf32>
    %11 = vector.broadcast %10 : vector<1x128xf32> to vector<64x128xf32>
    %12 = arith.addf %8, %11 : vector<64x128xf32>
    %cst_11 = arith.constant 0.000000e+00 : f32
    %13 = vector.broadcast %cst_11 : f32 to vector<64x128xf32>
    %14 = arith.maximumf %12, %13 : vector<64x128xf32>
    %15 = arith.addf %3, %14 : vector<64x128xf32>
    %c0_12 = arith.constant 0 : index
    %c0_13 = arith.constant 0 : index
    %16 = vector.load %arg5[%c0_12, %c0_13] : memref<64x128xf32, #tpu.memory_space<vmem>>, vector<64x128xf32>
    tpu.vector_store %arg5[%c0_12, %c0_13], %15 {strides = array<i32>} : memref<64x128xf32, #tpu.memory_space<vmem>>, vector<64x128xf32>,
    %c2_i32 = arith.constant 2 : i32
    %17 = arith.cmpi eq, %arg0, %c2_i32 : i32
    %18 = arith.extui %17 : i1 to i32
    %c0_i32_14 = arith.constant 0 : i32
    %19 = arith.cmpi ne, %18, %c0_i32_14 : i32
    scf.if %19 {
      %c0_15 = arith.constant 0 : index
      %c0_16 = arith.constant 0 : index
      %20 = vector.load %arg5[%c0_15, %c0_16] : memref<64x128xf32, #tpu.memory_space<vmem>>, vector<64x128xf32>
      %21 = arith.mulf %20, %20 : vector<64x128xf32>
      %cst_17 = arith.constant dense<0.000000e+00> : vector<64xf32>
      %22 = vector.multi_reduction <add>, %21, %cst_17 [1] : vector<64x128xf32> to vector<64xf32>
      %23 = vector.shape_cast %22 : vector<64xf32> to vector<64x1xf32>
      %cst_18 = arith.constant 1.000000e-24 : f32
      %24 = vector.broadcast %cst_18 : f32 to vector<64x1xf32>
      %25 = arith.maximumf %23, %24 : vector<64x1xf32>
      %26 = math.rsqrt %25 : vector<64x1xf32>
      %27 = vector.broadcast %26 : vector<64x1xf32> to vector<64x128xf32>
      %28 = arith.mulf %20, %27 : vector<64x128xf32>
      %c0_19 = arith.constant 0 : index
      %c0_20 = arith.constant 0 : index
      %29 = vector.load %arg5[%c0_19, %c0_20] : memref<64x128xf32, #tpu.memory_space<vmem>>, vector<64x128xf32>
      tpu.vector_store %arg5[%c0_19, %c0_20], %28 {strides = array<i32>} : memref<64x128xf32, #tpu.memory_space<vmem>>, vector<64x128xf32>,
    } else {
    }
    return
  }
  func.func @transform_1(%arg0: i32) -> (i32, i32) {
    %c0_i32 = arith.constant 0 : i32
    %c0_i32_0 = arith.constant 0 : i32
    %c0_i32_1 = arith.constant 0 : i32
    return %c0_i32, %c0_i32_0 : i32, i32
  }
  func.func @transform_2(%arg0: i32) -> (i32, i32, i32) {
    %c0_i32 = arith.constant 0 : i32
    %c0_i32_0 = arith.constant 0 : i32
    %c0_i32_1 = arith.constant 0 : i32
    return %arg0, %c0_i32, %c0_i32_0 : i32, i32, i32
  }
  func.func @transform_3(%arg0: i32) -> (i32, i32, i32) {
    %c0_i32 = arith.constant 0 : i32
    %c0_i32_0 = arith.constant 0 : i32
    %c0_i32_1 = arith.constant 0 : i32
    return %arg0, %c0_i32, %c0_i32_0 : i32, i32, i32
  }
  func.func @transform_4(%arg0: i32) -> (i32, i32) {
    %c0_i32 = arith.constant 0 : i32
    %c0_i32_0 = arith.constant 0 : i32
    %c0_i32_1 = arith.constant 0 : i32
    return %c0_i32, %c0_i32_0 : i32, i32
  }
}

module attributes {stable_mosaic.version = 11 : i64} {
  func.func @_stack_kernel(%arg0: i32, %arg1: memref<64x128xf32, #tpu.memory_space<any>>, %arg2: memref<64x64xf32, #tpu.memory_space<vmem>>, %arg3: memref<1x128x128xf32, #tpu.memory_space<vmem>>, %arg4: memref<1x1x128xf32, #tpu.memory_space<vmem>>, %arg5: memref<64x128xf32, #tpu.memory_space<vmem>>, %arg6: memref<!tpu.dma_semaphore, #tpu.memory_space<semaphore_mem>>) attributes {dimension_semantics = [#tpu.dimension_semantics<arbitrary>], iteration_bounds = array<i64: 3>, scalar_prefetch = 0 : i64, scratch_operands = 1 : i64, tpu.core_type = #tpu.core_type<tc>, window_params = [{}, {pipeline_mode = #tpu.pipeline_mode<synchronous>, transform_indices = @transform_1, window_bounds = array<i64: 64, 64>}, {transform_indices = @transform_2, window_bounds = array<i64: 1, 128, 128>}, {transform_indices = @transform_3, window_bounds = array<i64: 1, 1, 128>}, {pipeline_mode = #tpu.pipeline_mode<synchronous>, transform_indices = @transform_4, window_bounds = array<i64: 64, 128>}]} {
    %c0_i32 = arith.constant 0 : i32
    %0 = arith.cmpi eq, %arg0, %c0_i32 : i32
    %1 = arith.extui %0 : i1 to i32
    %c0_i32_0 = arith.constant 0 : i32
    %2 = arith.cmpi ne, %1, %c0_i32_0 : i32
    scf.if %2 {
      tpu.enqueue_dma source(%arg1 : memref<64x128xf32, #tpu.memory_space<any>>) target(%arg5 : memref<64x128xf32, #tpu.memory_space<vmem>>) target_semaphore(%arg6 : memref<!tpu.dma_semaphore, #tpu.memory_space<semaphore_mem>>)
      tpu.wait_dma2 semaphore(%arg6 : memref<!tpu.dma_semaphore, #tpu.memory_space<semaphore_mem>>) src(%arg1 : memref<64x128xf32, #tpu.memory_space<any>>) dst(%arg5 : memref<64x128xf32, #tpu.memory_space<vmem>>)
    } else {
    }
    %c0 = arith.constant 0 : index
    %c0_1 = arith.constant 0 : index
    %3 = vector.load %arg5[%c0, %c0_1] : memref<64x128xf32, #tpu.memory_space<vmem>>, vector<64x128xf32>
    %c0_2 = arith.constant 0 : index
    %c0_3 = arith.constant 0 : index
    %c0_4 = arith.constant 0 : index
    %4 = vector.load %arg3[%c0_2, %c0_3, %c0_4] : memref<1x128x128xf32, #tpu.memory_space<vmem>>, vector<1x128x128xf32>
    %5 = vector.shape_cast %4 : vector<1x128x128xf32> to vector<128x128xf32>
    %cst = arith.constant dense<0.000000e+00> : vector<64x128xf32>
    %6 = tpu.matmul %3, %5, %cst {dimension_numbers = #tpu.dot_dimension_numbers<[1], [0], [0], [1], [0, 0, 1, 1], [], []>} : vector<64x128xf32>, vector<128x128xf32>, vector<64x128xf32> -> vector<64x128xf32>
    %c0_5 = arith.constant 0 : index
    %c0_6 = arith.constant 0 : index
    %7 = vector.load %arg2[%c0_5, %c0_6] : memref<64x64xf32, #tpu.memory_space<vmem>>, vector<64x64xf32>
    %cst_7 = arith.constant dense<0.000000e+00> : vector<64x128xf32>
    %8 = tpu.matmul %7, %6, %cst_7 {dimension_numbers = #tpu.dot_dimension_numbers<[1], [0], [0], [1], [0, 0, 1, 1], [], []>} : vector<64x64xf32>, vector<64x128xf32>, vector<64x128xf32> -> vector<64x128xf32>
    %c0_8 = arith.constant 0 : index
    %c0_9 = arith.constant 0 : index
    %c0_10 = arith.constant 0 : index
    %9 = vector.load %arg4[%c0_8, %c0_9, %c0_10] : memref<1x1x128xf32, #tpu.memory_space<vmem>>, vector<1x1x128xf32>
    %10 = vector.shape_cast %9 : vector<1x1x128xf32> to vector<1x128xf32>
    %11 = vector.broadcast %10 : vector<1x128xf32> to vector<64x128xf32>
    %12 = arith.addf %8, %11 : vector<64x128xf32>
    %cst_11 = arith.constant 0.000000e+00 : f32
    %13 = vector.broadcast %cst_11 : f32 to vector<64x128xf32>
    %14 = arith.maximumf %12, %13 : vector<64x128xf32>
    %15 = arith.addf %3, %14 : vector<64x128xf32>
    %c0_12 = arith.constant 0 : index
    %c0_13 = arith.constant 0 : index
    %16 = vector.load %arg5[%c0_12, %c0_13] : memref<64x128xf32, #tpu.memory_space<vmem>>, vector<64x128xf32>
    tpu.vector_store %arg5[%c0_12, %c0_13], %15 {strides = array<i32>} : memref<64x128xf32, #tpu.memory_space<vmem>>, vector<64x128xf32>,
    %c2_i32 = arith.constant 2 : i32
    %17 = arith.cmpi eq, %arg0, %c2_i32 : i32
    %18 = arith.extui %17 : i1 to i32
    %c0_i32_14 = arith.constant 0 : i32
    %19 = arith.cmpi ne, %18, %c0_i32_14 : i32
    scf.if %19 {
      %c0_15 = arith.constant 0 : index
      %c0_16 = arith.constant 0 : index
      %20 = vector.load %arg5[%c0_15, %c0_16] : memref<64x128xf32, #tpu.memory_space<vmem>>, vector<64x128xf32>
      %21 = arith.mulf %20, %20 : vector<64x128xf32>
      %cst_17 = arith.constant dense<0.000000e+00> : vector<64xf32>
      %22 = vector.multi_reduction <add>, %21, %cst_17 [1] : vector<64x128xf32> to vector<64xf32>
      %23 = vector.shape_cast %22 : vector<64xf32> to vector<64x1xf32>
      %cst_18 = arith.constant 1.000000e-24 : f32
      %24 = vector.broadcast %cst_18 : f32 to vector<64x1xf32>
      %25 = arith.maximumf %23, %24 : vector<64x1xf32>
      %26 = math.rsqrt %25 : vector<64x1xf32>
      %27 = vector.broadcast %26 : vector<64x1xf32> to vector<64x128xf32>
      %28 = arith.mulf %20, %27 : vector<64x128xf32>
      %c0_19 = arith.constant 0 : index
      %c0_20 = arith.constant 0 : index
      %29 = vector.load %arg5[%c0_19, %c0_20] : memref<64x128xf32, #tpu.memory_space<vmem>>, vector<64x128xf32>
      tpu.vector_store %arg5[%c0_19, %c0_20], %28 {strides = array<i32>} : memref<64x128xf32, #tpu.memory_space<vmem>>, vector<64x128xf32>,
    } else {
    }
    return
  }
  func.func @transform_1(%arg0: i32) -> (i32, i32) {
    %c0_i32 = arith.constant 0 : i32
    %c0_i32_0 = arith.constant 0 : i32
    %c0_i32_1 = arith.constant 0 : i32
    return %c0_i32, %c0_i32_0 : i32, i32
  }
  func.func @transform_2(%arg0: i32) -> (i32, i32, i32) {
    %c0_i32 = arith.constant 0 : i32
    %c0_i32_0 = arith.constant 0 : i32
    %c0_i32_1 = arith.constant 0 : i32
    return %arg0, %c0_i32, %c0_i32_0 : i32, i32, i32
  }
  func.func @transform_3(%arg0: i32) -> (i32, i32, i32) {
    %c0_i32 = arith.constant 0 : i32
    %c0_i32_0 = arith.constant 0 : i32
    %c0_i32_1 = arith.constant 0 : i32
    return %arg0, %c0_i32, %c0_i32_0 : i32, i32, i32
  }
  func.func @transform_4(%arg0: i32) -> (i32, i32) {
    %c0_i32 = arith.constant 0 : i32
    %c0_i32_0 = arith.constant 0 : i32
    %c0_i32_1 = arith.constant 0 : i32
    return %c0_i32, %c0_i32_0 : i32, i32
  }
}

</mosaic_0001>

<bundles_post_ra>
// kernel: tpu_custom_call.1
= control target key start
LH: loop header
LB: loop body
LE: loop exit
PB: predicated region body
PF: predicated region fallthrough
CT: control target
= control target key end

     0   :  { %9 = vsyncpa [#allocation4], 0  ;;  %s1320_s0 = inlined_call_operand.hbm [shape: f32[64,128], index: 0, kind: input, shape index: {}]   ;;  %s1321_s1 = inlined_call_operand.hbm [shape: f32[64,64], index: 1, kind: input, shape index: {}]   ;;  %s1322_s2 = inlined_call_operand.hbm [shape: f32[3,128,128], index: 2, kind: input, shape index: {}]   ;;  %s1323_s3 = inlined_call_operand.vmem [shape: f32[3,1,128], index: 3, kind: input, shape index: {}]   ;;  %s1324_s4 = inlined_call_operand.hbm [shape: f32[64,128], index: 4, kind: output, shape index: {}]  }
   0x1   :  { %10 = vsyncpa [#allocation7], 0 }
   0x2   :  { %12 = vsyncpa [#allocation7 + $0x1], 0 }
   0x3   :  { %13 = vsyncpa [#allocation5], 0  ;;  %s1079_s15 = smov 0   ;;  %s1081_s16 = smov 0  }
   0x4   :  { %s1083_s17 = smov 0   ;;  %s1085_s18 = smov 0  }
   0x5 LB: > { %s1098_s19 = sadd.s32 4294967295, %s1045_s18   ;;  %p60_p0 = scmp.ne.s32.totalorder %s1037_s16, %s1033_s15  ;;  %s1045_s18 = sphi %s1085_s18, %s1343_s18   ;;  %s1041_s17 = sphi %s1083_s17, %s1342_s17   ;;  %s1037_s16 = sphi %s1081_s16, %s1341_s16   ;;  %s1033_s15 = sphi %s1079_s15, %s1340_s15  }
   0x6   : > { %p1325_p1 = scmp.eq.s32.totalorder %s1098_s19, 0  ;;  %p678_p2 = scmp.ge.s32.totalorder %s1045_s18, 1 }
   0x7   : > { %p118_p3 = scmp.lt.s32.totalorder %s1045_s18, 4  ;;  %s1047_s22 = smov [#allocation3]  }
   0x8   : > { %p1106_p4 = por %p1325_p1, %p60_p0  ;;  %s130_s23 = sshll.u32 %s1047_s22, 4  ;;  %s131_s23 = int_to_ptr.vmem [resolvable:$true] %s130_s23 }
   0x9   : > { %p1110_p5 = pnand %p678_p2, %p118_p3  ;;  %s1123_s25 = sadd.s32 1, %s1045_s18  }
   0xa   : > { %s1328_s20 = scalar_select %p1106_p4, 1, 0 }
   0xb   : > { %s1329_s21 = scalar_select %p1110_p5, 1, 0 }
   0xc   : > { %p829_p6 = pneg %p1110_p5  ;;  %s47_s26 = sadd.s32 1, %s1041_s17 }
   0xd   : > { %s44_s27 = ssub.s32 %s1045_s18, %s1123_s25  ;;  %s908_s28 = scalar_lea.vmem %s131_s23, 1024 }
   0xe   : > { %p1118_p7 = pnand %p829_p6, %p1325_p1  ;;  %p909_p9 = scmp.ne.s32.totalorder %s131_s23, %s908_s28 }
   0xf   : > { %p916_p12 = scmp.lt.s32.totalorder %s131_s23, %s131_s23  ;;  %p917_p13 = scmp.lt.s32.totalorder %s908_s28, %s908_s28 }
  0x10   : > { %p899_p8 = pneg %p1118_p7 }
  0x11   : > { %p918_p0 = por %p917_p13, %p916_p12 }
  0x12   : > { %p911_p10 = pnand %p909_p9, %p899_p8 }
  0x14   : > { %p912_p11 = pneg %p911_p10 }
  0x16   : > { %p919_p2 = pnand %p918_p0, %p912_p11 }
  0x18   : > { %922 = shalt.err (!%p919_p2)
}
  0x19   : > { %s1048_s29 = smov 128   ;;  %s1049_s30 = smov 8  }
  0x1a   : > { %832 = dma.hbm_to_vmem [thread:$0]  (!%p1118_p7), %s1321_s1, 1024, %s131_s23, [#allocation4], %s1048_s29, %s1048_s29, %s1049_s30  }
  0x1b   : > { %p45_p3 = scmp.eq.s32.totalorder %s44_s27, 0  ;;  %p54_p6 = scmp.ne.s32.totalorder %s1041_s17, %s1037_s16 }
  0x1c   : > { %p55_p8 = scmp.eq.s32.totalorder %s1045_s18, 0  ;;  %p838_p9 = scmp.lt.s32.totalorder %s1045_s18, 3 }
  0x1d   : > { %s1143_s7 = scalar_select %p45_p3, %s1041_s17, %s47_s26  }
  0x1e   : > { %p56_p10 = por %p55_p8, %p54_p6  ;;  %s144_s8 = sand.u32 1, %s1041_s17  }
  0x1f   : > { %s681_s9 = sshll.u32 %s144_s8, 7  ;;  %s703_s10 = sshll.u32 %s1045_s18, 11 }
  0x20   : > { %s1150_s13 = scalar_lea.hbm %s1322_s2, %s703_s10  ;;  %s148_s14 = scalar_lea.vmem [#allocation6], %s681_s9 }
  0x21   : > { %s155_s15 = sshll.u32 %s148_s14, 4  ;;  %p1154_p7 = pnand %p838_p9, %p56_p10  ;;  %s1152_s15 = int_to_ptr.vmem [resolvable:$true] %s155_s15 }
  0x22   : > { %s1158_s23 = scalar_lea.sflag [#allocation7], %s144_s8  ;;  %s923_s18 = scalar_lea.hbm %s1150_s13, 2048 }
  0x23   : > { %p924_p11 = scmp.ne.s32.totalorder %s1150_s13, %s923_s18  ;;  %p925_p12 = pneg %p1154_p7 }
  0x24   : > { %s928_s27 = scalar_lea.hbm %s1322_s2, 6144  ;;  %p929_p2 = scmp.lt.s32.totalorder %s1150_s13, %s1322_s2 }
  0x25   : > { %p926_p13 = pnand %p925_p12, %p924_p11  ;;  %p930_p3 = scmp.lt.s32.totalorder %s928_s27, %s923_s18 }
  0x27   : > { %p927_p0 = pneg %p926_p13  ;;  %p931_p6 = por %p930_p3, %p929_p2 }
  0x29   : > { %p932_p8 = pnand %p931_p6, %p927_p0 }
  0x2b   : > { %935 = shalt.err (!%p932_p8)
}
  0x2c   : > { %s936_s6 = scalar_lea.vmem %s1152_s15, 2048  ;;  %s1050_s8 = smov [#allocation6]  }
  0x2d   : > { %p937_p9 = scmp.ne.s32.totalorder %s1152_s15, %s936_s6  ;;  %s941_s9 = sshll.u32 %s1050_s8, 4  ;;  %s942_s9 = int_to_ptr.vmem [resolvable:$false] %s941_s9 }
  0x2e   : > { %s943_s10 = scalar_lea.vmem %s942_s9, 4096  ;;  %p944_p13 = scmp.lt.s32.totalorder %s1152_s15, %s942_s9 }
  0x2f   : > { %p939_p10 = pnand %p937_p9, %p925_p12  ;;  %p945_p1 = scmp.lt.s32.totalorder %s943_s10, %s936_s6 }
  0x31   : > { %p940_p11 = pneg %p939_p10  ;;  %p946_p4 = por %p945_p1, %p944_p13 }
  0x33   : > { %p947_p5 = pnand %p946_p4, %p940_p11 }
  0x35   : > { %950 = shalt.err (!%p947_p5)
}
  0x36   : > { %836 = dma.hbm_to_vmem [thread:$0]  (!%p1154_p7), %s1150_s13, 2048, %s1152_s15, %s1158_s23, %s1048_s29, %s1048_s29, %s1049_s30  }
  0x37   : > { %p1332_p12 = scmp.ne.s32.totalorder %s1329_s21, 0 }
  0x38   : > { %p1333_p0 = scmp.eq.s32.totalorder (!%p1332_p12), %s1098_s19, 0 }
  0x39   : > { %173 = sbr.rel (%p1332_p12) target bundleno = 738 (0x2e2), region = 32 }
  0x3e   : > { %1016 = dma.done.wait (%p1333_p0), [#allocation4], 1024   ;;  %p1334_p2 = pmov %p1333_p0 }
  0x3f   : > { %s179_s11 = sand.u32 1, %s1037_s16   ;;  %p1335_p1 = scmp.ne.s32.totalorder %s1328_s20, 0 }
  0x40   : > { %1018 = vsyncadd (%p1334_p2), [#allocation4], 4294966272  ;;  %s686_s12 = sshll.u32 %s179_s11, 7  ;;  %s180_s14 = scalar_lea.sflag [#allocation7], %s179_s11 }
  0x41   : > { %s1189_s22 = scalar_lea.vmem [#allocation6], %s686_s12 }
  0x42   : > { %1020 = dma.done.wait (%p1335_p1), %s180_s14, 2048  }
  0x43   : > { %1022 = vsyncadd (%p1335_p1), %s180_s14, 4294965248  ;;  %p204_p4 = scmp.lt.s32.totalorder %s1098_s19, 2  ;;  %s1051_s21 = smov [#allocation8]  }
  0x44   : > { %s218_s29 = sshll.u32 %s1051_s21, 4  ;;  %p1336_p7 = pmov %p1333_p0  ;;  %s1199_s29 = int_to_ptr.vmem [resolvable:$true] %s218_s29 }
  0x45   : > { %s1197_s30 = scalar_select %p204_p4, %s1098_s19, 2 }
  0x46   : > { %s1206_s23 = scalar_lea.vmem %s1199_s29, 1024  ;;  %p968_p8 = scmp.lt.s32.totalorder %s1199_s29, %s1199_s29 }
  0x47   : > { %s206_s20 = scalar_lea.vmem %s1323_s3, %s1197_s30  ;;  %p962_p5 = scmp.ne.s32.totalorder %s1199_s29, %s1206_s23 }
  0x48   : > { %p969_p9 = scmp.lt.s32.totalorder %s1206_s23, %s1206_s23 }
  0x49   : > { %p963_p3 = pnand %p962_p5, %p1336_p7 }
  0x4a   : > { %p1219_p10 = por %p969_p9, %p968_p8 }
  0x4b   : > { %p964_p6 = pneg %p963_p3 }
  0x4d   : > { %p971_p11 = pnand %p1219_p10, %p964_p6 }
  0x4f   : > { %974 = shalt.err (!%p971_p11)  }
  0x50   : > { %p1338_p13 = pmov %p1333_p0  ;;  %p1339_p12 = pmov %p1333_p0 }
  0x52   : > { %823 = dma.hbm_to_vmem [thread:$0]  (%p1338_p13), %s1320_s0, 1024, %s1199_s29, [#allocation2] }
  0x53   : > { %1024 = dma.done.wait (%p1339_p12), [#allocation2], 1024 }
  0x54   : > { %1026 = vsyncadd (%p1333_p0), [#allocation2], 4294966272  ;;  %v248_v0 = vld [vmem:[%s1189_s22 + $0x78] sm:$0xff]  ;;  %v247_v1 = vld [vmem:[%s1189_s22 + $0x70] sm:$0xff]  ;;  %vm369_vm0 = vcmask 523264   ;;  %p697_p2 = scmp.ne.s32.totalorder %s1098_s19, 2 }
  0x55   : > { %744 = vmatprep.subr.mxu0 %v248_v0  ;;  %v246_v2 = vld [vmem:[%s1189_s22 + $0x68] sm:$0xff]  ;;  %v245_v3 = vld [vmem:[%s1189_s22 + $0x60] sm:$0xff]  ;;  %v244_v5 = vld [vmem:[%s1189_s22 + $0x58] sm:$0xff] }
  0x56   : > { %745 = vmatpush3.msra.mxu0 %v248_v0  ;;  %v1239_v4 = vld [vmem:[#allocation8] sm:$0xff]  ;;  %v243_v6 = vld [vmem:[%s1189_s22 + $0x50] sm:$0xff]  ;;  %v242_v7 = vld [vmem:[%s1189_s22 + $0x48] sm:$0xff] }
  0x57   : > { %746 = vmatprep.subr.mxu0 %v247_v1  ;;  %776 = vmatprep.mubr.f32.mxu0 %v1239_v4  ;;  %v241_v8 = vld [vmem:[%s1189_s22 + $0x40] sm:$0xff]  ;;  %v240_v9 = vld [vmem:[%s1189_s22 + $0x38] sm:$0xff]  ;;  %v239_v10 = vld [vmem:[%s1189_s22 + $0x30] sm:$0xff] }
  0x58   : > { %747 = vmatpush3.msra.mxu0 %v247_v1  ;;  %v238_v11 = vld [vmem:[%s1189_s22 + $0x28] sm:$0xff]  ;;  %v237_v12 = vld [vmem:[%s1189_s22 + $0x20] sm:$0xff]  ;;  %v236_v13 = vld [vmem:[%s1189_s22 + $0x18] sm:$0xff] }
  0x59   : > { %748 = vmatprep.subr.mxu0 %v246_v2  ;;  %v235_v14 = vld [vmem:[%s1189_s22 + $0x10] sm:$0xff]  ;;  %v234_v15 = vld [vmem:[%s1189_s22 + $0x8] sm:$0xff]  ;;  %v233_v16 = vld [vmem:[%s1189_s22] sm:$0xff] }
  0x5a   : > { %749 = vmatpush3.msra.mxu0 %v246_v2  ;;  %v1254_v17 = vld [vmem:[#allocation8 + $0x8] sm:$0xff]  ;;  %v1256_v18 = vld [vmem:[#allocation8 + $0x10] sm:$0xff]  ;;  %v1260_v19 = vld [vmem:[#allocation8 + $0x18] sm:$0xff] }
  0x5b   : > { %750 = vmatprep.subr.mxu0 %v245_v3  ;;  %v1262_v20 = vld [vmem:[#allocation8 + $0x20] sm:$0xff]  ;;  %v1266_v21 = vld [vmem:[#allocation8 + $0x28] sm:$0xff]  ;;  %v1268_v22 = vld [vmem:[#allocation8 + $0x30] sm:$0xff] }
  0x5c   : > { %751 = vmatpush3.msra.mxu0 %v245_v3  ;;  %v1272_v23 = vld [vmem:[#allocation8 + $0x38] sm:$0xff]  ;;  %v354_v24 = vld [vmem:[#allocation3] sm:$0xff]  ;;  %v355_v33 = vld [vmem:[#allocation3 + $0x8] sm:$0xff] }
  0x5d   : > { %752 = vmatprep.subr.mxu0 %v244_v5  ;;  %804 = vmatprep.mubr.msk.f32.mxu1 %vm369_vm0, %v354_v24  ;;  %v356_v34 = vld [vmem:[#allocation3 + $0x10] sm:$0xff]  ;;  %v357_v35 = vld [vmem:[#allocation3 + $0x18] sm:$0xff]  ;;  %v358_v36 = vld [vmem:[#allocation3 + $0x20] sm:$0xff] }
  0x5e   : > { %753 = vmatpush3.msra.mxu0 %v244_v5  ;;  %v359_v37 = vld [vmem:[#allocation3 + $0x28] sm:$0xff]  ;;  %v360_v38 = vld [vmem:[#allocation3 + $0x30] sm:$0xff]  ;;  %v361_v39 = vld [vmem:[#allocation3 + $0x38] sm:$0xff] }
  0x5f   : > { %754 = vmatprep.subr.mxu0 %v243_v6  ;;  %v688_v40 = vld [vmem:[%s206_s20] ss:$0 sm:$0xff] }
  0x60   : > { %755 = vmatpush3.msra.mxu0 %v243_v6 }
  0x61   : > { %756 = vmatprep.subr.mxu0 %v242_v7 }
  0x62   : > { %757 = vmatpush3.msra.mxu0 %v242_v7 }
  0x63   : > { %758 = vmatprep.subr.mxu0 %v241_v8 }
  0x64   : > { %759 = vmatpush3.msra.mxu0 %v241_v8 }
  0x65   : > { %760 = vmatprep.subr.mxu0 %v240_v9 }
  0x66   : > { %761 = vmatpush3.msra.mxu0 %v240_v9 }
  0x67   : > { %762 = vmatprep.subr.mxu0 %v239_v10 }
  0x68   : > { %763 = vmatpush3.msra.mxu0 %v239_v10 }
  0x69   : > { %764 = vmatprep.subr.mxu0 %v238_v11 }
  0x6a   : > { %765 = vmatpush3.msra.mxu0 %v238_v11 }
  0x6b   : > { %766 = vmatprep.subr.mxu0 %v237_v12 }
  0x6c   : > { %767 = vmatpush3.msra.mxu0 %v237_v12 }
  0x6d   : > { %768 = vmatprep.subr.mxu0 %v236_v13 }
  0x6e   : > { %769 = vmatpush3.msra.mxu0 %v236_v13 }
  0x6f   : > { %770 = vmatprep.subr.mxu0 %v235_v14 }
  0x70   : > { %771 = vmatpush3.msra.mxu0 %v235_v14 }
  0x71   : > { %772 = vmatprep.subr.mxu0 %v234_v15 }
  0x72   : > { %773 = vmatpush3.msra.mxu0 %v234_v15 }
  0x73   : > { %774 = vmatprep.subr.mxu0 %v233_v16 }
  0x74   : > { %775 = vmatpush3.msra.mxu0 %v233_v16 }
  0x75   : > { %777 = vmatmul.mubr.f32.vlgmr.msra.gmra.mxu0 %v1254_v17 }
  0x76   : > { %779 = vmatprep.mubr.f32.mxu0 %v1256_v18 }
  0x79   : > { %780 = vmatmul.mubr.f32.gmra.mxu0 %v1260_v19 }
  0x7a   : > { %782 = vmatprep.mubr.f32.mxu0 %v1262_v20 }
  0x7d   : > { %783 = vmatmul.mubr.f32.gmra.mxu0 %v1266_v21 }
  0x7e   : > { %785 = vmatprep.mubr.f32.mxu0 %v1268_v22 }
  0x81   : > { %786 = vmatmul.mubr.f32.gmra.mxu0 %v1272_v23 }
 0x135   : > { %v778_v25 = vpop.f32.mrf.mxu0 }
 0x137   : > { %v315_v26 = vpop.f32.mrf.mxu0 }
 0x139   : > { %v781_v27 = vpop.f32.mrf.mxu0 }
 0x13b   : > { %v325_v28 = vpop.f32.mrf.mxu0 }
 0x13d   : > { %v784_v29 = vpop.f32.mrf.mxu0 }
 0x13f   : > { %v335_v30 = vpop.f32.mrf.mxu0 }
 0x141   : > { %v787_v31 = vpop.f32.mrf.mxu0 }
 0x142   : > { %788 = vmatprep.subr.mxu1 %v787_v31 }
 0x143   : > { %v345_v32 = vpop.f32.mrf.mxu0  ;;  %789 = vmatpush3.msra.mxu1 %v787_v31 }
 0x144   : > { %790 = vmatprep.subr.mxu1 %v345_v32 }
 0x145   : > { %791 = vmatpush3.msra.mxu1 %v345_v32 }
 0x146   : > { %792 = vmatprep.subr.mxu1 %v784_v29 }
 0x147   : > { %793 = vmatpush3.msra.mxu1 %v784_v29 }
 0x148   : > { %794 = vmatprep.subr.mxu1 %v335_v30 }
 0x149   : > { %795 = vmatpush3.msra.mxu1 %v335_v30 }
 0x14a   : > { %796 = vmatprep.subr.mxu1 %v781_v27 }
 0x14b   : > { %797 = vmatpush3.msra.mxu1 %v781_v27 }
 0x14c   : > { %798 = vmatprep.subr.mxu1 %v325_v28 }
 0x14d   : > { %799 = vmatpush3.msra.mxu1 %v325_v28 }
 0x14e   : > { %800 = vmatprep.subr.mxu1 %v778_v25 }
 0x14f   : > { %801 = vmatpush3.msra.mxu1 %v778_v25 }
 0x150   : > { %802 = vmatprep.subr.mxu1 %v315_v26 }
 0x151   : > { %803 = vmatpush3.msra.mxu1 %v315_v26 }
 0x152   : > { %805 = vmatmul.mubr.msk.f32.vlgmr.msra.gmra.mxu1 %vm369_vm0, %v355_v33 }
 0x153   : > { %807 = vmatprep.mubr.msk.f32.mxu1 %vm369_vm0, %v356_v34 }
 0x156   : > { %808 = vmatmul.mubr.msk.f32.gmra.mxu1 %vm369_vm0, %v357_v35 }
 0x157   : > { %810 = vmatprep.mubr.msk.f32.mxu1 %vm369_vm0, %v358_v36 }
 0x15a   : > { %811 = vmatmul.mubr.msk.f32.gmra.mxu1 %vm369_vm0, %v359_v37 }
 0x15b   : > { %813 = vmatprep.mubr.msk.f32.mxu1 %vm369_vm0, %v360_v38 }
 0x15e   : > { %814 = vmatmul.mubr.msk.f32.gmra.mxu1 %vm369_vm0, %v361_v39 }
 0x212   : > { %v806_v41 = vpop.f32.mrf.mxu1 }
 0x213   : > { %v466_v42 = vadd.f32 %v806_v41, %v688_v40 }
 0x214   : > { %v460_v43 = vpop.f32.mrf.mxu1 }
 0x215   : > { %v500_v44 = vmax.f32 %v466_v42, 0.0  ;;  %v461_v45 = vadd.f32 %v688_v40, %v460_v43 }
 0x216   : > { %v809_v46 = vpop.f32.mrf.mxu1 }
 0x217   : > { %v508_v47 = vadd.f32 %v500_v44, %v1254_v17  ;;  %v499_v48 = vmax.f32 %v461_v45, 0.0  ;;  %v476_v49 = vadd.f32 %v809_v46, %v688_v40 }
 0x218   : > { %v470_v50 = vpop.f32.mrf.mxu1 }
 0x219   : > { %516 = vst [vmem:[#allocation8 + $0x8] sm:$0xff] %v508_v47  ;;  %v507_v51 = vadd.f32 %v499_v48, %v1239_v4  ;;  %v502_v52 = vmax.f32 %v476_v49, 0.0  ;;  %v471_v53 = vadd.f32 %v688_v40, %v470_v50 }
 0x21a   : > { %v812_v54 = vpop.f32.mrf.mxu1 }
 0x21b   : > { %515 = vst [vmem:[#allocation8] sm:$0xff] %v507_v51  ;;  %v510_v55 = vadd.f32 %v502_v52, %v1260_v19  ;;  %v501_v56 = vmax.f32 %v471_v53, 0.0  ;;  %v486_v57 = vadd.f32 %v812_v54, %v688_v40 }
 0x21c   : > { %v480_v58 = vpop.f32.mrf.mxu1 }
 0x21d   : > { %518 = vst [vmem:[#allocation8 + $0x18] sm:$0xff] %v510_v55  ;;  %v509_v59 = vadd.f32 %v501_v56, %v1256_v18  ;;  %v504_v60 = vmax.f32 %v486_v57, 0.0  ;;  %v481_v61 = vadd.f32 %v688_v40, %v480_v58 }
 0x21e   : > { %v815_v62 = vpop.f32.mrf.mxu1 }
 0x21f   : > { %517 = vst [vmem:[#allocation8 + $0x10] sm:$0xff] %v509_v59  ;;  %v512_v63 = vadd.f32 %v504_v60, %v1266_v21  ;;  %v503_v0 = vmax.f32 %v481_v61, 0.0  ;;  %v496_v1 = vadd.f32 %v815_v62, %v688_v40 }
 0x220   : > { %v490_v2 = vpop.f32.mrf.mxu1 }
 0x221   : > { %520 = vst [vmem:[#allocation8 + $0x28] sm:$0xff] %v512_v63  ;;  %v511_v3 = vadd.f32 %v503_v0, %v1262_v20  ;;  %v506_v4 = vmax.f32 %v496_v1, 0.0  ;;  %v491_v5 = vadd.f32 %v688_v40, %v490_v2 }
 0x223   : > { %519 = vst [vmem:[#allocation8 + $0x20] sm:$0xff] %v511_v3  ;;  %v514_v6 = vadd.f32 %v506_v4, %v1272_v23  ;;  %v505_v7 = vmax.f32 %v491_v5, 0.0  ;;  %526 = sbr.rel (%p697_p2) target bundleno = 725 (0x2d5), region = 52 }
 0x225   : > { %522 = vst [vmem:[#allocation8 + $0x38] sm:$0xff] %v514_v6  ;;  %v513_v8 = vadd.f32 %v505_v7, %v1268_v22 }
 0x227   : > { %521 = vst [vmem:[#allocation8 + $0x30] sm:$0xff] %v513_v8 }
 0x228   : > { %v529_v9 = vld [vmem:[#allocation8 + $0x10] sm:$0xff]  ;;  %v527_v10 = vld [vmem:[#allocation8] sm:$0xff]  ;;  %v530_v11 = vld [vmem:[#allocation8 + $0x18] sm:$0xff] }
 0x229   : > { %v537_v12 = vmul.f32 %v529_v9, %v529_v9  ;;  %v535_v13 = vmul.f32 %v527_v10, %v527_v10  ;;  %v528_v14 = vld [vmem:[#allocation8 + $0x8] sm:$0xff]  ;;  %v538_v15 = vmul.f32 %v530_v11, %v530_v11 }
 0x22a   : > { %v536_v16 = vmul.f32 %v528_v14, %v528_v14  ;;  %v532_v17 = vld [vmem:[#allocation8 + $0x28] sm:$0xff]  ;;  %v531_v18 = vld [vmem:[#allocation8 + $0x20] sm:$0xff] }
 0x22b   : > { %547 = vadd.xlane.f32.xlu1 %v537_v12  ;;  %543 = vadd.xlane.f32.xlu0 %v535_v13  ;;  %v540_v19 = vmul.f32 %v532_v17, %v532_v17  ;;  %v539_v20 = vmul.f32 %v531_v18, %v531_v18 }
 0x22c   : > { %v534_v21 = vld [vmem:[#allocation8 + $0x38] sm:$0xff] }
 0x22d   : > { %v542_v23 = vmul.f32 %v534_v21, %v534_v21 }
 0x22e   : > { %v533_v22 = vld [vmem:[#allocation8 + $0x30] sm:$0xff] }
 0x22f   : > { %549 = vadd.xlane.f32.xlu1 %v538_v15  ;;  %545 = vadd.xlane.f32.xlu0 %v536_v16  ;;  %v541_v24 = vmul.f32 %v533_v22, %v533_v22 }
 0x233   : > { %553 = vadd.xlane.f32.xlu1 %v540_v19  ;;  %551 = vadd.xlane.f32.xlu0 %v539_v20 }
 0x237   : > { %557 = vadd.xlane.f32.xlu1 %v542_v23  ;;  %555 = vadd.xlane.f32.xlu0 %v541_v24 }
 0x2b4   : > { %v548_v25 = vpop.xlane.xlu1 %547  ;;  %v544_v26 = vpop.xlane.xlu0 %543 }
 0x2b5   : > { %v561_v27 = vmax.f32 %v548_v25, 1e-24  ;;  %v559_v28 = vmax.f32 %v544_v26, 1e-24 }
 0x2b7   : > { %881 = vrsqrt.f32 %v561_v27 }
 0x2b8   : > { %883 = vrsqrt.f32 %v559_v28  ;;  %v550_v29 = vpop.xlane.xlu1 %549  ;;  %v546_v30 = vpop.xlane.xlu0 %545 }
 0x2b9   : > { %v562_v31 = vmax.f32 %v550_v29, 1e-24  ;;  %v560_v32 = vmax.f32 %v546_v30, 1e-24 }
 0x2bb   : > { %885 = vrsqrt.f32 %v562_v31 }
 0x2bc   : > { %887 = vrsqrt.f32 %v560_v32  ;;  %v554_v33 = vpop.xlane.xlu1 %553  ;;  %v552_v34 = vpop.xlane.xlu0 %551 }
 0x2bd   : > { %v564_v35 = vmax.f32 %v554_v33, 1e-24  ;;  %v563_v36 = vmax.f32 %v552_v34, 1e-24 }
 0x2bf   : > { %889 = vrsqrt.f32 %v564_v35 }
 0x2c0   : > { %891 = vrsqrt.f32 %v563_v36  ;;  %v558_v37 = vpop.xlane.xlu1 %557  ;;  %v556_v38 = vpop.xlane.xlu0 %555 }
 0x2c1   : > { %v566_v39 = vmax.f32 %v558_v37, 1e-24  ;;  %v565_v40 = vmax.f32 %v556_v38, 1e-24 }
 0x2c3   : > { %893 = vrsqrt.f32 %v566_v39 }
 0x2c4   : > { %v882_v41 = vpop.eup %881  ;;  %895 = vrsqrt.f32 %v565_v40 }
 0x2c5   : > { %v884_v42 = vpop.eup %883  ;;  %v577_v43 = vmul.f32 %v882_v41, %v529_v9 }
 0x2c6   : > { %v575_v44 = vmul.f32 %v884_v42, %v527_v10 }
 0x2c7   : > { %585 = vst [vmem:[#allocation8 + $0x10] sm:$0xff] %v577_v43 }
 0x2c8   : > { %v886_v45 = vpop.eup %885  ;;  %583 = vst [vmem:[#allocation8] sm:$0xff] %v575_v44 }
 0x2c9   : > { %v888_v46 = vpop.eup %887  ;;  %v578_v47 = vmul.f32 %v886_v45, %v530_v11 }
 0x2ca   : > { %v576_v48 = vmul.f32 %v888_v46, %v528_v14 }
 0x2cb   : > { %586 = vst [vmem:[#allocation8 + $0x18] sm:$0xff] %v578_v47 }
 0x2cc   : > { %v890_v49 = vpop.eup %889  ;;  %584 = vst [vmem:[#allocation8 + $0x8] sm:$0xff] %v576_v48 }
 0x2cd   : > { %v892_v50 = vpop.eup %891  ;;  %v580_v51 = vmul.f32 %v890_v49, %v532_v17 }
 0x2ce   : > { %v579_v52 = vmul.f32 %v892_v50, %v531_v18 }
 0x2cf   : > { %588 = vst [vmem:[#allocation8 + $0x28] sm:$0xff] %v580_v51 }
 0x2d0   : > { %v894_v53 = vpop.eup %893  ;;  %587 = vst [vmem:[#allocation8 + $0x20] sm:$0xff] %v579_v52 }
 0x2d1   : > { %v896_v54 = vpop.eup %895  ;;  %v582_v55 = vmul.f32 %v894_v53, %v534_v21 }
 0x2d2   : > { %v581_v56 = vmul.f32 %v896_v54, %v533_v22 }
 0x2d3   : > { %590 = vst [vmem:[#allocation8 + $0x38] sm:$0xff] %v582_v55 }
 0x2d4   : > { %589 = vst [vmem:[#allocation8 + $0x30] sm:$0xff] %v581_v56 }
 0x2d5 PF: > { %p841_p1 = scmp.eq.s32.totalorder %s1098_s19, 2 }
 0x2d7   : > { %p977_p4 = pnand %p962_p5, %p841_p1 }
 0x2d9   : > { %p978_p7 = pneg %p977_p4 }
 0x2db   : > { %p985_p3 = pnand %p978_p7, %p1219_p10 }
 0x2dd   : > { %988 = shalt.err (!%p985_p3)
}
 0x2de   : > { %s1052_s5 = smov 128   ;;  %s1053_s6 = smov 8  }
 0x2df   : > { %826 = dma.vmem_to_hbm [thread:$0]  (%p841_p1), %s1199_s29, 1024, %s1324_s4, [#allocation5], %s1052_s5, %s1052_s5, %s1053_s6  }
 0x2e0   : > { %1028 = dma.done.wait (%p841_p1), [#allocation5], 1024  }
 0x2e1   : > { %1030 = vsyncadd (%p841_p1), [#allocation5], 4294966272 }
 0x2e2 PF: > { %p16_p5 = scmp.ge.s32.totalorder %s1123_s25, 5   ;;  %s1340_s15 = smov %s1037_s16 }
 0x2e3   : > { %s1341_s16 = smov %s1041_s17  ;;  %s1342_s17 = smov %s1143_s7 }
 0x2e4   : > { %s1343_s18 = smov %s1123_s25  ;;  %18 = sbr.rel (!%p16_p5) target bundleno = 5 (0x5), region = 89 }
 0x2e9   :  { %613 = vsyncpa [#allocation4], 1 }
 0x2ea   :  { %615 = vsyncpa [#allocation4 + $0x1], 1 }
 0x2eb   :  { %616 = vsyncpa [#allocation7], 1 }
 0x2ec   :  { %618 = vsyncpa [#allocation7 + $0x1], 1 }
 0x2ed   :  { %619 = vsyncpa [#allocation5], 1 }
 0x2ee   :  { %621 = vsyncpa [#allocation5 + $0x1], 1 }
 0x2ef   :  { %622 = vsyncmov [#allocation2] }
 0x2f2   :  { %s623_s19 = vpop.sfrf %622 }
 0x2f3   :  { %p702_p6 = scmp.ne.s32.totalorder %s623_s19, 0 }
 0x2f5   :  { %627 = shalt.err (%p702_p6)  }

// kernel: tpu_custom_call.1
= control target key start
LH: loop header
LB: loop body
LE: loop exit
PB: predicated region body
PF: predicated region fallthrough
CT: control target
= control target key end

     0   :  { %9 = vsyncpa [#allocation4], 0  ;;  %s1320_s0 = inlined_call_operand.hbm [shape: f32[64,128], index: 0, kind: input, shape index: {}]   ;;  %s1321_s1 = inlined_call_operand.hbm [shape: f32[64,64], index: 1, kind: input, shape index: {}]   ;;  %s1322_s2 = inlined_call_operand.hbm [shape: f32[3,128,128], index: 2, kind: input, shape index: {}]   ;;  %s1323_s3 = inlined_call_operand.vmem [shape: f32[3,1,128], index: 3, kind: input, shape index: {}]   ;;  %s1324_s4 = inlined_call_operand.hbm [shape: f32[64,128], index: 4, kind: output, shape index: {}]  }
   0x1   :  { %10 = vsyncpa [#allocation7], 0 }
   0x2   :  { %12 = vsyncpa [#allocation7 + $0x1], 0 }
   0x3   :  { %13 = vsyncpa [#allocation5], 0  ;;  %s1079_s15 = smov 0   ;;  %s1081_s16 = smov 0  }
   0x4   :  { %s1083_s17 = smov 0   ;;  %s1085_s18 = smov 0  }
   0x5 LB: > { %s1098_s19 = sadd.s32 4294967295, %s1045_s18   ;;  %p60_p0 = scmp.ne.s32.totalorder %s1037_s16, %s1033_s15  ;;  %s1045_s18 = sphi %s1085_s18, %s1343_s18   ;;  %s1041_s17 = sphi %s1083_s17, %s1342_s17   ;;  %s1037_s16 = sphi %s1081_s16, %s1341_s16   ;;  %s1033_s15 = sphi %s1079_s15, %s1340_s15  }
   0x6   : > { %p1325_p1 = scmp.eq.s32.totalorder %s1098_s19, 0  ;;  %p678_p2 = scmp.ge.s32.totalorder %s1045_s18, 1 }
   0x7   : > { %p118_p3 = scmp.lt.s32.totalorder %s1045_s18, 4  ;;  %s1047_s22 = smov [#allocation3]  }
   0x8   : > { %p1106_p4 = por %p1325_p1, %p60_p0  ;;  %s130_s23 = sshll.u32 %s1047_s22, 4  ;;  %s131_s23 = int_to_ptr.vmem [resolvable:$true] %s130_s23 }
   0x9   : > { %p1110_p5 = pnand %p678_p2, %p118_p3  ;;  %s1123_s25 = sadd.s32 1, %s1045_s18  }
   0xa   : > { %s1328_s20 = scalar_select %p1106_p4, 1, 0 }
   0xb   : > { %s1329_s21 = scalar_select %p1110_p5, 1, 0 }
   0xc   : > { %p829_p6 = pneg %p1110_p5  ;;  %s47_s26 = sadd.s32 1, %s1041_s17 }
   0xd   : > { %s44_s27 = ssub.s32 %s1045_s18, %s1123_s25  ;;  %s908_s28 = scalar_lea.vmem %s131_s23, 1024 }
   0xe   : > { %p1118_p7 = pnand %p829_p6, %p1325_p1  ;;  %p909_p9 = scmp.ne.s32.totalorder %s131_s23, %s908_s28 }
   0xf   : > { %p916_p12 = scmp.lt.s32.totalorder %s131_s23, %s131_s23  ;;  %p917_p13 = scmp.lt.s32.totalorder %s908_s28, %s908_s28 }
  0x10   : > { %p899_p8 = pneg %p1118_p7 }
  0x11   : > { %p918_p0 = por %p917_p13, %p916_p12 }
  0x12   : > { %p911_p10 = pnand %p909_p9, %p899_p8 }
  0x14   : > { %p912_p11 = pneg %p911_p10 }
  0x16   : > { %p919_p2 = pnand %p918_p0, %p912_p11 }
  0x18   : > { %922 = shalt.err (!%p919_p2)
}
  0x19   : > { %s1048_s29 = smov 128   ;;  %s1049_s30 = smov 8  }
  0x1a   : > { %832 = dma.hbm_to_vmem [thread:$0]  (!%p1118_p7), %s1321_s1, 1024, %s131_s23, [#allocation4], %s1048_s29, %s1048_s29, %s1049_s30  }
  0x1b   : > { %p45_p3 = scmp.eq.s32.totalorder %s44_s27, 0  ;;  %p54_p6 = scmp.ne.s32.totalorder %s1041_s17, %s1037_s16 }
  0x1c   : > { %p55_p8 = scmp.eq.s32.totalorder %s1045_s18, 0  ;;  %p838_p9 = scmp.lt.s32.totalorder %s1045_s18, 3 }
  0x1d   : > { %s1143_s7 = scalar_select %p45_p3, %s1041_s17, %s47_s26  }
  0x1e   : > { %p56_p10 = por %p55_p8, %p54_p6  ;;  %s144_s8 = sand.u32 1, %s1041_s17  }
  0x1f   : > { %s681_s9 = sshll.u32 %s144_s8, 7  ;;  %s703_s10 = sshll.u32 %s1045_s18, 11 }
  0x20   : > { %s1150_s13 = scalar_lea.hbm %s1322_s2, %s703_s10  ;;  %s148_s14 = scalar_lea.vmem [#allocation6], %s681_s9 }
  0x21   : > { %s155_s15 = sshll.u32 %s148_s14, 4  ;;  %p1154_p7 = pnand %p838_p9, %p56_p10  ;;  %s1152_s15 = int_to_ptr.vmem [resolvable:$true] %s155_s15 }
  0x22   : > { %s1158_s23 = scalar_lea.sflag [#allocation7], %s144_s8  ;;  %s923_s18 = scalar_lea.hbm %s1150_s13, 2048 }
  0x23   : > { %p924_p11 = scmp.ne.s32.totalorder %s1150_s13, %s923_s18  ;;  %p925_p12 = pneg %p1154_p7 }
  0x24   : > { %s928_s27 = scalar_lea.hbm %s1322_s2, 6144  ;;  %p929_p2 = scmp.lt.s32.totalorder %s1150_s13, %s1322_s2 }
  0x25   : > { %p926_p13 = pnand %p925_p12, %p924_p11  ;;  %p930_p3 = scmp.lt.s32.totalorder %s928_s27, %s923_s18 }
  0x27   : > { %p927_p0 = pneg %p926_p13  ;;  %p931_p6 = por %p930_p3, %p929_p2 }
  0x29   : > { %p932_p8 = pnand %p931_p6, %p927_p0 }
  0x2b   : > { %935 = shalt.err (!%p932_p8)
}
  0x2c   : > { %s936_s6 = scalar_lea.vmem %s1152_s15, 2048  ;;  %s1050_s8 = smov [#allocation6]  }
  0x2d   : > { %p937_p9 = scmp.ne.s32.totalorder %s1152_s15, %s936_s6  ;;  %s941_s9 = sshll.u32 %s1050_s8, 4  ;;  %s942_s9 = int_to_ptr.vmem [resolvable:$false] %s941_s9 }
  0x2e   : > { %s943_s10 = scalar_lea.vmem %s942_s9, 4096  ;;  %p944_p13 = scmp.lt.s32.totalorder %s1152_s15, %s942_s9 }
  0x2f   : > { %p939_p10 = pnand %p937_p9, %p925_p12  ;;  %p945_p1 = scmp.lt.s32.totalorder %s943_s10, %s936_s6 }
  0x31   : > { %p940_p11 = pneg %p939_p10  ;;  %p946_p4 = por %p945_p1, %p944_p13 }
  0x33   : > { %p947_p5 = pnand %p946_p4, %p940_p11 }
  0x35   : > { %950 = shalt.err (!%p947_p5)
}
  0x36   : > { %836 = dma.hbm_to_vmem [thread:$0]  (!%p1154_p7), %s1150_s13, 2048, %s1152_s15, %s1158_s23, %s1048_s29, %s1048_s29, %s1049_s30  }
  0x37   : > { %p1332_p12 = scmp.ne.s32.totalorder %s1329_s21, 0 }
  0x38   : > { %p1333_p0 = scmp.eq.s32.totalorder (!%p1332_p12), %s1098_s19, 0 }
  0x39   : > { %173 = sbr.rel (%p1332_p12) target bundleno = 738 (0x2e2), region = 32 }
  0x3e   : > { %1016 = dma.done.wait (%p1333_p0), [#allocation4], 1024   ;;  %p1334_p2 = pmov %p1333_p0 }
  0x3f   : > { %s179_s11 = sand.u32 1, %s1037_s16   ;;  %p1335_p1 = scmp.ne.s32.totalorder %s1328_s20, 0 }
  0x40   : > { %1018 = vsyncadd (%p1334_p2), [#allocation4], 4294966272  ;;  %s686_s12 = sshll.u32 %s179_s11, 7  ;;  %s180_s14 = scalar_lea.sflag [#allocation7], %s179_s11 }
  0x41   : > { %s1189_s22 = scalar_lea.vmem [#allocation6], %s686_s12 }
  0x42   : > { %1020 = dma.done.wait (%p1335_p1), %s180_s14, 2048  }
  0x43   : > { %1022 = vsyncadd (%p1335_p1), %s180_s14, 4294965248  ;;  %p204_p4 = scmp.lt.s32.totalorder %s1098_s19, 2  ;;  %s1051_s21 = smov [#allocation8]  }
  0x44   : > { %s218_s29 = sshll.u32 %s1051_s21, 4  ;;  %p1336_p7 = pmov %p1333_p0  ;;  %s1199_s29 = int_to_ptr.vmem [resolvable:$true] %s218_s29 }
  0x45   : > { %s1197_s30 = scalar_select %p204_p4, %s1098_s19, 2 }
  0x46   : > { %s1206_s23 = scalar_lea.vmem %s1199_s29, 1024  ;;  %p968_p8 = scmp.lt.s32.totalorder %s1199_s29, %s1199_s29 }
  0x47   : > { %s206_s20 = scalar_lea.vmem %s1323_s3, %s1197_s30  ;;  %p962_p5 = scmp.ne.s32.totalorder %s1199_s29, %s1206_s23 }
  0x48   : > { %p969_p9 = scmp.lt.s32.totalorder %s1206_s23, %s1206_s23 }
  0x49   : > { %p963_p3 = pnand %p962_p5, %p1336_p7 }
  0x4a   : > { %p1219_p10 = por %p969_p9, %p968_p8 }
  0x4b   : > { %p964_p6 = pneg %p963_p3 }
  0x4d   : > { %p971_p11 = pnand %p1219_p10, %p964_p6 }
  0x4f   : > { %974 = shalt.err (!%p971_p11)  }
  0x50   : > { %p1338_p13 = pmov %p1333_p0  ;;  %p1339_p12 = pmov %p1333_p0 }
  0x52   : > { %823 = dma.hbm_to_vmem [thread:$0]  (%p1338_p13), %s1320_s0, 1024, %s1199_s29, [#allocation2] }
  0x53   : > { %1024 = dma.done.wait (%p1339_p12), [#allocation2], 1024 }
  0x54   : > { %1026 = vsyncadd (%p1333_p0), [#allocation2], 4294966272  ;;  %v248_v0 = vld [vmem:[%s1189_s22 + $0x78] sm:$0xff]  ;;  %v247_v1 = vld [vmem:[%s1189_s22 + $0x70] sm:$0xff]  ;;  %vm369_vm0 = vcmask 523264   ;;  %p697_p2 = scmp.ne.s32.totalorder %s1098_s19, 2 }
  0x55   : > { %744 = vmatprep.subr.mxu0 %v248_v0  ;;  %v246_v2 = vld [vmem:[%s1189_s22 + $0x68] sm:$0xff]  ;;  %v245_v3 = vld [vmem:[%s1189_s22 + $0x60] sm:$0xff]  ;;  %v244_v5 = vld [vmem:[%s1189_s22 + $0x58] sm:$0xff] }
  0x56   : > { %745 = vmatpush3.msra.mxu0 %v248_v0  ;;  %v1239_v4 = vld [vmem:[#allocation8] sm:$0xff]  ;;  %v243_v6 = vld [vmem:[%s1189_s22 + $0x50] sm:$0xff]  ;;  %v242_v7 = vld [vmem:[%s1189_s22 + $0x48] sm:$0xff] }
  0x57   : > { %746 = vmatprep.subr.mxu0 %v247_v1  ;;  %776 = vmatprep.mubr.f32.mxu0 %v1239_v4  ;;  %v241_v8 = vld [vmem:[%s1189_s22 + $0x40] sm:$0xff]  ;;  %v240_v9 = vld [vmem:[%s1189_s22 + $0x38] sm:$0xff]  ;;  %v239_v10 = vld [vmem:[%s1189_s22 + $0x30] sm:$0xff] }
  0x58   : > { %747 = vmatpush3.msra.mxu0 %v247_v1  ;;  %v238_v11 = vld [vmem:[%s1189_s22 + $0x28] sm:$0xff]  ;;  %v237_v12 = vld [vmem:[%s1189_s22 + $0x20] sm:$0xff]  ;;  %v236_v13 = vld [vmem:[%s1189_s22 + $0x18] sm:$0xff] }
  0x59   : > { %748 = vmatprep.subr.mxu0 %v246_v2  ;;  %v235_v14 = vld [vmem:[%s1189_s22 + $0x10] sm:$0xff]  ;;  %v234_v15 = vld [vmem:[%s1189_s22 + $0x8] sm:$0xff]  ;;  %v233_v16 = vld [vmem:[%s1189_s22] sm:$0xff] }
  0x5a   : > { %749 = vmatpush3.msra.mxu0 %v246_v2  ;;  %v1254_v17 = vld [vmem:[#allocation8 + $0x8] sm:$0xff]  ;;  %v1256_v18 = vld [vmem:[#allocation8 + $0x10] sm:$0xff]  ;;  %v1260_v19 = vld [vmem:[#allocation8 + $0x18] sm:$0xff] }
  0x5b   : > { %750 = vmatprep.subr.mxu0 %v245_v3  ;;  %v1262_v20 = vld [vmem:[#allocation8 + $0x20] sm:$0xff]  ;;  %v1266_v21 = vld [vmem:[#allocation8 + $0x28] sm:$0xff]  ;;  %v1268_v22 = vld [vmem:[#allocation8 + $0x30] sm:$0xff] }
  0x5c   : > { %751 = vmatpush3.msra.mxu0 %v245_v3  ;;  %v1272_v23 = vld [vmem:[#allocation8 + $0x38] sm:$0xff]  ;;  %v354_v24 = vld [vmem:[#allocation3] sm:$0xff]  ;;  %v355_v33 = vld [vmem:[#allocation3 + $0x8] sm:$0xff] }
  0x5d   : > { %752 = vmatprep.subr.mxu0 %v244_v5  ;;  %804 = vmatprep.mubr.msk.f32.mxu1 %vm369_vm0, %v354_v24  ;;  %v356_v34 = vld [vmem:[#allocation3 + $0x10] sm:$0xff]  ;;  %v357_v35 = vld [vmem:[#allocation3 + $0x18] sm:$0xff]  ;;  %v358_v36 = vld [vmem:[#allocation3 + $0x20] sm:$0xff] }
  0x5e   : > { %753 = vmatpush3.msra.mxu0 %v244_v5  ;;  %v359_v37 = vld [vmem:[#allocation3 + $0x28] sm:$0xff]  ;;  %v360_v38 = vld [vmem:[#allocation3 + $0x30] sm:$0xff]  ;;  %v361_v39 = vld [vmem:[#allocation3 + $0x38] sm:$0xff] }
  0x5f   : > { %754 = vmatprep.subr.mxu0 %v243_v6  ;;  %v688_v40 = vld [vmem:[%s206_s20] ss:$0 sm:$0xff] }
  0x60   : > { %755 = vmatpush3.msra.mxu0 %v243_v6 }
  0x61   : > { %756 = vmatprep.subr.mxu0 %v242_v7 }
  0x62   : > { %757 = vmatpush3.msra.mxu0 %v242_v7 }
  0x63   : > { %758 = vmatprep.subr.mxu0 %v241_v8 }
  0x64   : > { %759 = vmatpush3.msra.mxu0 %v241_v8 }
  0x65   : > { %760 = vmatprep.subr.mxu0 %v240_v9 }
  0x66   : > { %761 = vmatpush3.msra.mxu0 %v240_v9 }
  0x67   : > { %762 = vmatprep.subr.mxu0 %v239_v10 }
  0x68   : > { %763 = vmatpush3.msra.mxu0 %v239_v10 }
  0x69   : > { %764 = vmatprep.subr.mxu0 %v238_v11 }
  0x6a   : > { %765 = vmatpush3.msra.mxu0 %v238_v11 }
  0x6b   : > { %766 = vmatprep.subr.mxu0 %v237_v12 }
  0x6c   : > { %767 = vmatpush3.msra.mxu0 %v237_v12 }
  0x6d   : > { %768 = vmatprep.subr.mxu0 %v236_v13 }
  0x6e   : > { %769 = vmatpush3.msra.mxu0 %v236_v13 }
  0x6f   : > { %770 = vmatprep.subr.mxu0 %v235_v14 }
  0x70   : > { %771 = vmatpush3.msra.mxu0 %v235_v14 }
  0x71   : > { %772 = vmatprep.subr.mxu0 %v234_v15 }
  0x72   : > { %773 = vmatpush3.msra.mxu0 %v234_v15 }
  0x73   : > { %774 = vmatprep.subr.mxu0 %v233_v16 }
  0x74   : > { %775 = vmatpush3.msra.mxu0 %v233_v16 }
  0x75   : > { %777 = vmatmul.mubr.f32.vlgmr.msra.gmra.mxu0 %v1254_v17 }
  0x76   : > { %779 = vmatprep.mubr.f32.mxu0 %v1256_v18 }
  0x79   : > { %780 = vmatmul.mubr.f32.gmra.mxu0 %v1260_v19 }
  0x7a   : > { %782 = vmatprep.mubr.f32.mxu0 %v1262_v20 }
  0x7d   : > { %783 = vmatmul.mubr.f32.gmra.mxu0 %v1266_v21 }
  0x7e   : > { %785 = vmatprep.mubr.f32.mxu0 %v1268_v22 }
  0x81   : > { %786 = vmatmul.mubr.f32.gmra.mxu0 %v1272_v23 }
 0x135   : > { %v778_v25 = vpop.f32.mrf.mxu0 }
 0x137   : > { %v315_v26 = vpop.f32.mrf.mxu0 }
 0x139   : > { %v781_v27 = vpop.f32.mrf.mxu0 }
 0x13b   : > { %v325_v28 = vpop.f32.mrf.mxu0 }
 0x13d   : > { %v784_v29 = vpop.f32.mrf.mxu0 }
 0x13f   : > { %v335_v30 = vpop.f32.mrf.mxu0 }
 0x141   : > { %v787_v31 = vpop.f32.mrf.mxu0 }
 0x142   : > { %788 = vmatprep.subr.mxu1 %v787_v31 }
 0x143   : > { %v345_v32 = vpop.f32.mrf.mxu0  ;;  %789 = vmatpush3.msra.mxu1 %v787_v31 }
 0x144   : > { %790 = vmatprep.subr.mxu1 %v345_v32 }
 0x145   : > { %791 = vmatpush3.msra.mxu1 %v345_v32 }
 0x146   : > { %792 = vmatprep.subr.mxu1 %v784_v29 }
 0x147   : > { %793 = vmatpush3.msra.mxu1 %v784_v29 }
 0x148   : > { %794 = vmatprep.subr.mxu1 %v335_v30 }
 0x149   : > { %795 = vmatpush3.msra.mxu1 %v335_v30 }
 0x14a   : > { %796 = vmatprep.subr.mxu1 %v781_v27 }
 0x14b   : > { %797 = vmatpush3.msra.mxu1 %v781_v27 }
 0x14c   : > { %798 = vmatprep.subr.mxu1 %v325_v28 }
 0x14d   : > { %799 = vmatpush3.msra.mxu1 %v325_v28 }
 0x14e   : > { %800 = vmatprep.subr.mxu1 %v778_v25 }
 0x14f   : > { %801 = vmatpush3.msra.mxu1 %v778_v25 }
 0x150   : > { %802 = vmatprep.subr.mxu1 %v315_v26 }
 0x151   : > { %803 = vmatpush3.msra.mxu1 %v315_v26 }
 0x152   : > { %805 = vmatmul.mubr.msk.f32.vlgmr.msra.gmra.mxu1 %vm369_vm0, %v355_v33 }
 0x153   : > { %807 = vmatprep.mubr.msk.f32.mxu1 %vm369_vm0, %v356_v34 }
 0x156   : > { %808 = vmatmul.mubr.msk.f32.gmra.mxu1 %vm369_vm0, %v357_v35 }
 0x157   : > { %810 = vmatprep.mubr.msk.f32.mxu1 %vm369_vm0, %v358_v36 }
 0x15a   : > { %811 = vmatmul.mubr.msk.f32.gmra.mxu1 %vm369_vm0, %v359_v37 }
 0x15b   : > { %813 = vmatprep.mubr.msk.f32.mxu1 %vm369_vm0, %v360_v38 }
 0x15e   : > { %814 = vmatmul.mubr.msk.f32.gmra.mxu1 %vm369_vm0, %v361_v39 }
 0x212   : > { %v806_v41 = vpop.f32.mrf.mxu1 }
 0x213   : > { %v466_v42 = vadd.f32 %v806_v41, %v688_v40 }
 0x214   : > { %v460_v43 = vpop.f32.mrf.mxu1 }
 0x215   : > { %v500_v44 = vmax.f32 %v466_v42, 0.0  ;;  %v461_v45 = vadd.f32 %v688_v40, %v460_v43 }
 0x216   : > { %v809_v46 = vpop.f32.mrf.mxu1 }
 0x217   : > { %v508_v47 = vadd.f32 %v500_v44, %v1254_v17  ;;  %v499_v48 = vmax.f32 %v461_v45, 0.0  ;;  %v476_v49 = vadd.f32 %v809_v46, %v688_v40 }
 0x218   : > { %v470_v50 = vpop.f32.mrf.mxu1 }
 0x219   : > { %516 = vst [vmem:[#allocation8 + $0x8] sm:$0xff] %v508_v47  ;;  %v507_v51 = vadd.f32 %v499_v48, %v1239_v4  ;;  %v502_v52 = vmax.f32 %v476_v49, 0.0  ;;  %v471_v53 = vadd.f32 %v688_v40, %v470_v50 }
 0x21a   : > { %v812_v54 = vpop.f32.mrf.mxu1 }
 0x21b   : > { %515 = vst [vmem:[#allocation8] sm:$0xff] %v507_v51  ;;  %v510_v55 = vadd.f32 %v502_v52, %v1260_v19  ;;  %v501_v56 = vmax.f32 %v471_v53, 0.0  ;;  %v486_v57 = vadd.f32 %v812_v54, %v688_v40 }
 0x21c   : > { %v480_v58 = vpop.f32.mrf.mxu1 }
 0x21d   : > { %518 = vst [vmem:[#allocation8 + $0x18] sm:$0xff] %v510_v55  ;;  %v509_v59 = vadd.f32 %v501_v56, %v1256_v18  ;;  %v504_v60 = vmax.f32 %v486_v57, 0.0  ;;  %v481_v61 = vadd.f32 %v688_v40, %v480_v58 }
 0x21e   : > { %v815_v62 = vpop.f32.mrf.mxu1 }
 0x21f   : > { %517 = vst [vmem:[#allocation8 + $0x10] sm:$0xff] %v509_v59  ;;  %v512_v63 = vadd.f32 %v504_v60, %v1266_v21  ;;  %v503_v0 = vmax.f32 %v481_v61, 0.0  ;;  %v496_v1 = vadd.f32 %v815_v62, %v688_v40 }
 0x220   : > { %v490_v2 = vpop.f32.mrf.mxu1 }
 0x221   : > { %520 = vst [vmem:[#allocation8 + $0x28] sm:$0xff] %v512_v63  ;;  %v511_v3 = vadd.f32 %v503_v0, %v1262_v20  ;;  %v506_v4 = vmax.f32 %v496_v1, 0.0  ;;  %v491_v5 = vadd.f32 %v688_v40, %v490_v2 }
 0x223   : > { %519 = vst [vmem:[#allocation8 + $0x20] sm:$0xff] %v511_v3  ;;  %v514_v6 = vadd.f32 %v506_v4, %v1272_v23  ;;  %v505_v7 = vmax.f32 %v491_v5, 0.0  ;;  %526 = sbr.rel (%p697_p2) target bundleno = 725 (0x2d5), region = 52 }
 0x225   : > { %522 = vst [vmem:[#allocation8 + $0x38] sm:$0xff] %v514_v6  ;;  %v513_v8 = vadd.f32 %v505_v7, %v1268_v22 }
 0x227   : > { %521 = vst [vmem:[#allocation8 + $0x30] sm:$0xff] %v513_v8 }
 0x228   : > { %v529_v9 = vld [vmem:[#allocation8 + $0x10] sm:$0xff]  ;;  %v527_v10 = vld [vmem:[#allocation8] sm:$0xff]  ;;  %v530_v11 = vld [vmem:[#allocation8 + $0x18] sm:$0xff] }
 0x229   : > { %v537_v12 = vmul.f32 %v529_v9, %v529_v9  ;;  %v535_v13 = vmul.f32 %v527_v10, %v527_v10  ;;  %v528_v14 = vld [vmem:[#allocation8 + $0x8] sm:$0xff]  ;;  %v538_v15 = vmul.f32 %v530_v11, %v530_v11 }
 0x22a   : > { %v536_v16 = vmul.f32 %v528_v14, %v528_v14  ;;  %v532_v17 = vld [vmem:[#allocation8 + $0x28] sm:$0xff]  ;;  %v531_v18 = vld [vmem:[#allocation8 + $0x20] sm:$0xff] }
 0x22b   : > { %547 = vadd.xlane.f32.xlu1 %v537_v12  ;;  %543 = vadd.xlane.f32.xlu0 %v535_v13  ;;  %v540_v19 = vmul.f32 %v532_v17, %v532_v17  ;;  %v539_v20 = vmul.f32 %v531_v18, %v531_v18 }
 0x22c   : > { %v534_v21 = vld [vmem:[#allocation8 + $0x38] sm:$0xff] }
 0x22d   : > { %v542_v23 = vmul.f32 %v534_v21, %v534_v21 }
 0x22e   : > { %v533_v22 = vld [vmem:[#allocation8 + $0x30] sm:$0xff] }
 0x22f   : > { %549 = vadd.xlane.f32.xlu1 %v538_v15  ;;  %545 = vadd.xlane.f32.xlu0 %v536_v16  ;;  %v541_v24 = vmul.f32 %v533_v22, %v533_v22 }
 0x233   : > { %553 = vadd.xlane.f32.xlu1 %v540_v19  ;;  %551 = vadd.xlane.f32.xlu0 %v539_v20 }
 0x237   : > { %557 = vadd.xlane.f32.xlu1 %v542_v23  ;;  %555 = vadd.xlane.f32.xlu0 %v541_v24 }
 0x2b4   : > { %v548_v25 = vpop.xlane.xlu1 %547  ;;  %v544_v26 = vpop.xlane.xlu0 %543 }
 0x2b5   : > { %v561_v27 = vmax.f32 %v548_v25, 1e-24  ;;  %v559_v28 = vmax.f32 %v544_v26, 1e-24 }
 0x2b7   : > { %881 = vrsqrt.f32 %v561_v27 }
 0x2b8   : > { %883 = vrsqrt.f32 %v559_v28  ;;  %v550_v29 = vpop.xlane.xlu1 %549  ;;  %v546_v30 = vpop.xlane.xlu0 %545 }
 0x2b9   : > { %v562_v31 = vmax.f32 %v550_v29, 1e-24  ;;  %v560_v32 = vmax.f32 %v546_v30, 1e-24 }
 0x2bb   : > { %885 = vrsqrt.f32 %v562_v31 }
 0x2bc   : > { %887 = vrsqrt.f32 %v560_v32  ;;  %v554_v33 = vpop.xlane.xlu1 %553  ;;  %v552_v34 = vpop.xlane.xlu0 %551 }
 0x2bd   : > { %v564_v35 = vmax.f32 %v554_v33, 1e-24  ;;  %v563_v36 = vmax.f32 %v552_v34, 1e-24 }
 0x2bf   : > { %889 = vrsqrt.f32 %v564_v35 }
 0x2c0   : > { %891 = vrsqrt.f32 %v563_v36  ;;  %v558_v37 = vpop.xlane.xlu1 %557  ;;  %v556_v38 = vpop.xlane.xlu0 %555 }
 0x2c1   : > { %v566_v39 = vmax.f32 %v558_v37, 1e-24  ;;  %v565_v40 = vmax.f32 %v556_v38, 1e-24 }
 0x2c3   : > { %893 = vrsqrt.f32 %v566_v39 }
 0x2c4   : > { %v882_v41 = vpop.eup %881  ;;  %895 = vrsqrt.f32 %v565_v40 }
 0x2c5   : > { %v884_v42 = vpop.eup %883  ;;  %v577_v43 = vmul.f32 %v882_v41, %v529_v9 }
 0x2c6   : > { %v575_v44 = vmul.f32 %v884_v42, %v527_v10 }
 0x2c7   : > { %585 = vst [vmem:[#allocation8 + $0x10] sm:$0xff] %v577_v43 }
 0x2c8   : > { %v886_v45 = vpop.eup %885  ;;  %583 = vst [vmem:[#allocation8] sm:$0xff] %v575_v44 }
 0x2c9   : > { %v888_v46 = vpop.eup %887  ;;  %v578_v47 = vmul.f32 %v886_v45, %v530_v11 }
 0x2ca   : > { %v576_v48 = vmul.f32 %v888_v46, %v528_v14 }
 0x2cb   : > { %586 = vst [vmem:[#allocation8 + $0x18] sm:$0xff] %v578_v47 }
 0x2cc   : > { %v890_v49 = vpop.eup %889  ;;  %584 = vst [vmem:[#allocation8 + $0x8] sm:$0xff] %v576_v48 }
 0x2cd   : > { %v892_v50 = vpop.eup %891  ;;  %v580_v51 = vmul.f32 %v890_v49, %v532_v17 }
 0x2ce   : > { %v579_v52 = vmul.f32 %v892_v50, %v531_v18 }
 0x2cf   : > { %588 = vst [vmem:[#allocation8 + $0x28] sm:$0xff] %v580_v51 }
 0x2d0   : > { %v894_v53 = vpop.eup %893  ;;  %587 = vst [vmem:[#allocation8 + $0x20] sm:$0xff] %v579_v52 }
 0x2d1   : > { %v896_v54 = vpop.eup %895  ;;  %v582_v55 = vmul.f32 %v894_v53, %v534_v21 }
 0x2d2   : > { %v581_v56 = vmul.f32 %v896_v54, %v533_v22 }
 0x2d3   : > { %590 = vst [vmem:[#allocation8 + $0x38] sm:$0xff] %v582_v55 }
 0x2d4   : > { %589 = vst [vmem:[#allocation8 + $0x30] sm:$0xff] %v581_v56 }
 0x2d5 PF: > { %p841_p1 = scmp.eq.s32.totalorder %s1098_s19, 2 }
 0x2d7   : > { %p977_p4 = pnand %p962_p5, %p841_p1 }
 0x2d9   : > { %p978_p7 = pneg %p977_p4 }
 0x2db   : > { %p985_p3 = pnand %p978_p7, %p1219_p10 }
 0x2dd   : > { %988 = shalt.err (!%p985_p3)
}
 0x2de   : > { %s1052_s5 = smov 128   ;;  %s1053_s6 = smov 8  }
 0x2df   : > { %826 = dma.vmem_to_hbm [thread:$0]  (%p841_p1), %s1199_s29, 1024, %s1324_s4, [#allocation5], %s1052_s5, %s1052_s5, %s1053_s6  }
 0x2e0   : > { %1028 = dma.done.wait (%p841_p1), [#allocation5], 1024  }
 0x2e1   : > { %1030 = vsyncadd (%p841_p1), [#allocation5], 4294966272 }
 0x2e2 PF: > { %p16_p5 = scmp.ge.s32.totalorder %s1123_s25, 5   ;;  %s1340_s15 = smov %s1037_s16 }
 0x2e3   : > { %s1341_s16 = smov %s1041_s17  ;;  %s1342_s17 = smov %s1143_s7 }
 0x2e4   : > { %s1343_s18 = smov %s1123_s25  ;;  %18 = sbr.rel (!%p16_p5) target bundleno = 5 (0x5), region = 89 }
 0x2e9   :  { %613 = vsyncpa [#allocation4], 1 }
 0x2ea   :  { %615 = vsyncpa [#allocation4 + $0x1], 1 }
 0x2eb   :  { %616 = vsyncpa [#allocation7], 1 }
 0x2ec   :  { %618 = vsyncpa [#allocation7 + $0x1], 1 }
 0x2ed   :  { %619 = vsyncpa [#allocation5], 1 }
 0x2ee   :  { %621 = vsyncpa [#allocation5 + $0x1], 1 }
 0x2ef   :  { %622 = vsyncmov [#allocation2] }
 0x2f2   :  { %s623_s19 = vpop.sfrf %622 }
 0x2f3   :  { %p702_p6 = scmp.ne.s32.totalorder %s623_s19, 0 }
 0x2f5   :  { %627 = shalt.err (%p702_p6)  }

</bundles_post_ra>
